<compile_context>
chip_gen: v6e
topology: v6e:2x2x1
jax: 0.10.0
libtpu: 0.0.40
codegen_flags: <defaults>
</compile_context>

<pallas_src>
import functools

import jax
import jax.numpy as jnp
from jax.experimental import pallas as pl
from jax.experimental.pallas import tpu as pltpu


_VMEM_LIMIT = 32 * 1024 * 1024  # explicit scoped-VMEM limit (safe on v5e/v6e/v7x)


def _round_up(x, m):
    return (x + m - 1) // m * m


def _pick_tile(dim, target, mult):
    """Tile = `target` for large dims, else the dim rounded up to `mult`."""
    if dim >= target:
        return target
    return _round_up(dim, mult)


# ----------------------------- Pallas kernels -------------------------------

def _make_matmul_kernel(has_bias, has_residual, activation):
    """Tiled matmul with K-accumulation and fused bias/QuickGELU/residual epilogue."""

    def kernel(*refs):
        x_ref, w_ref = refs[0], refs[1]
        idx = 2
        b_ref = None
        r_ref = None
        if has_bias:
            b_ref = refs[idx]
            idx += 1
        if has_residual:
            r_ref = refs[idx]
            idx += 1
        o_ref, acc_ref = refs[idx], refs[idx + 1]

        @pl.when(pl.program_id(2) == 0)
        def _():
            acc_ref[...] = jnp.zeros_like(acc_ref)

        # bf16 operands -> MXU, f32 accumulation.
        acc_ref[...] += jnp.dot(x_ref[...], w_ref[...],
                                preferred_element_type=jnp.float32)

        @pl.when(pl.program_id(2) == pl.num_programs(2) - 1)
        def _():
            y = acc_ref[...]
            if has_bias:
                y = y + b_ref[...].astype(jnp.float32)
            if activation == "quick_gelu":          # CLIP's QuickGELU (f32 on VPU/EUP)
                y = y * jax.nn.sigmoid(1.702 * y)
            if has_residual:
                y = y + r_ref[...].astype(jnp.float32)
            o_ref[...] = y.astype(o_ref.dtype)

    return kernel


def _layernorm_kernel(x_ref, g_ref, b_ref, o_ref, *, eps):
    x = x_ref[...].astype(jnp.float32)
    mean = jnp.mean(x, axis=-1, keepdims=True)
    var = jnp.mean(jnp.square(x - mean), axis=-1, keepdims=True)
    xn = (x - mean) * jax.lax.rsqrt(var + eps)
    o_ref[...] = (xn * g_ref[...] + b_ref[...]).astype(o_ref.dtype)


def _attention_kernel(qkv_ref, o_ref, *, heads, head_dim, scale):
    """One batch element per grid step.

    qkv_ref: (1, S, 3*width) bf16 slab straight out of the QKV matmul
             (columns = [Q heads | K heads | V heads]).
    o_ref:   (1, S, width) lane-dense output slab (feeds out-proj directly).
    """
    width = heads * head_dim
    qkv = qkv_ref[0]                                      # (S, 3*width), bf16
    outs = []
    for h in range(heads):
        q = qkv[:, h * head_dim:(h + 1) * head_dim]
        k = qkv[:, width + h * head_dim: width + (h + 1) * head_dim]
        v = qkv[:, 2 * width + h * head_dim: 2 * width + (h + 1) * head_dim]
        # scores: contract over head_dim (rhs transposed natively on MXU)
        s = jax.lax.dot_general(q, k, (((1,), (1,)), ((), ())),
                                preferred_element_type=jnp.float32) * scale
        s = s - jnp.max(s, axis=-1, keepdims=True)
        p = jnp.exp(s)                                    # f32 (v5e-safe EUP)
        l = jnp.sum(p, axis=-1, keepdims=True)
        o = jnp.dot(p.astype(qkv.dtype), v, preferred_element_type=jnp.float32)
        # normalize the small (S, Dh) output instead of the (S, S) probs;
        # approx reciprocal runs on the EUP slot.
        o = o * pl.reciprocal(l, approx=True)
        outs.append(o)
    # single lane-dense store of the full (S, width) slab
    o_ref[0] = jnp.concatenate(outs, axis=-1).astype(o_ref.dtype)
    # TODO(synk): for long sequences, switch to a flash-style KV grid axis with
    # online softmax instead of materializing full (S, S) scores per head.


# ------------------------------ Pallas wrappers ------------------------------

def matmul_bias(x, w, bias=None, residual=None, activation=None,
                out_dtype=jnp.float32, tm_target=256, tn_target=256, tk_target=512):
    """(M,K)@(K,N) [+bias] [+QuickGELU] [+residual], tiled + K-accumulated."""
    M, K = x.shape
    K2, N = w.shape
    assert K == K2

    tm = _pick_tile(M, tm_target, 8)
    tn = _pick_tile(N, tn_target, 128)
    tk = _pick_tile(K, tk_target, 128)
    Mp, Np, Kp = _round_up(M, tm), _round_up(N, tn), _round_up(K, tk)

    xp = jnp.pad(x, ((0, Mp - M), (0, Kp - K))).astype(jnp.bfloat16)
    wp = jnp.pad(w, ((0, Kp - K), (0, Np - N))).astype(jnp.bfloat16)

    operands = [xp, wp]
    in_specs = [
        pl.BlockSpec((tm, tk), lambda i, j, k: (i, k)),
        pl.BlockSpec((tk, tn), lambda i, j, k: (k, j)),
    ]
    has_bias = bias is not None
    has_residual = residual is not None
    if has_bias:
        bp = jnp.pad(bias.reshape(1, N).astype(jnp.float32), ((0, 0), (0, Np - N)))
        operands.append(bp)
        in_specs.append(pl.BlockSpec((1, tn), lambda i, j, k: (0, j)))
    if has_residual:
        rp = jnp.pad(residual.astype(jnp.float32), ((0, Mp - M), (0, Np - N)))
        operands.append(rp)
        in_specs.append(pl.BlockSpec((tm, tn), lambda i, j, k: (i, j)))

    out = pl.pallas_call(
        _make_matmul_kernel(has_bias, has_residual, activation),
        out_shape=jax.ShapeDtypeStruct((Mp, Np), out_dtype),
        grid=(Mp // tm, Np // tn, Kp // tk),
        in_specs=in_specs,
        out_specs=pl.BlockSpec((tm, tn), lambda i, j, k: (i, j)),
        scratch_shapes=[pltpu.VMEM((tm, tn), jnp.float32)],
        compiler_params=pltpu.CompilerParams(
            dimension_semantics=("parallel", "parallel", "arbitrary"),
            vmem_limit_bytes=_VMEM_LIMIT),
    )(*operands)
    return out[:M, :N]


def layernorm(x, g, b, eps=1e-5, out_dtype=jnp.float32, tm_target=256):
    M, D = x.shape
    tm = _pick_tile(M, tm_target, 8)
    Mp = _round_up(M, tm)
    xp = jnp.pad(x.astype(jnp.float32), ((0, Mp - M), (0, 0)))
    out = pl.pallas_call(
        functools.partial(_layernorm_kernel, eps=eps),
        out_shape=jax.ShapeDtypeStruct((Mp, D), out_dtype),
        grid=(Mp // tm,),
        in_specs=[pl.BlockSpec((tm, D), lambda i: (i, 0)),
                  pl.BlockSpec((1, D), lambda i: (0, 0)),
                  pl.BlockSpec((1, D), lambda i: (0, 0))],
        out_specs=pl.BlockSpec((tm, D), lambda i: (i, 0)),
        compiler_params=pltpu.CompilerParams(
            dimension_semantics=("parallel",),
            vmem_limit_bytes=_VMEM_LIMIT),
    )(xp, g.reshape(1, D).astype(jnp.float32), b.reshape(1, D).astype(jnp.float32))
    return out[:M]


def attention(qkv, *, heads, scale):
    """qkv: (B, S, 3*width) -> (B, S, width), one batch element per grid step."""
    B, S, threeW = qkv.shape
    width = threeW // 3
    head_dim = width // heads
    return pl.pallas_call(
        functools.partial(_attention_kernel, heads=heads, head_dim=head_dim,
                          scale=scale),
        out_shape=jax.ShapeDtypeStruct((B, S, width), jnp.bfloat16),
        grid=(B,),
        in_specs=[pl.BlockSpec((1, S, threeW), lambda b: (b, 0, 0))],
        out_specs=pl.BlockSpec((1, S, width), lambda b: (b, 0, 0)),
        compiler_params=pltpu.CompilerParams(
            dimension_semantics=("parallel",),
            vmem_limit_bytes=_VMEM_LIMIT),
    )(qkv)


# ------------------------------ model (glue) --------------------------------

def init_params(key, C, patch, width, layers, heads, embed_dim, num_patches):
    def nrm(k, shape, scale=0.02):
        return scale * jax.random.normal(k, shape, jnp.float32)

    keys = iter(jax.random.split(key, 8 + layers * 8))
    p = {
        "conv_w": nrm(next(keys), (C * patch * patch, width)),
        "class_emb": nrm(next(keys), (width,)),
        "pos_emb": nrm(next(keys), (num_patches + 1, width)),
        "ln_pre_g": jnp.ones((width,), jnp.float32),
        "ln_pre_b": jnp.zeros((width,), jnp.float32),
        "ln_post_g": jnp.ones((width,), jnp.float32),
        "ln_post_b": jnp.zeros((width,), jnp.float32),
        "proj": nrm(next(keys), (width, embed_dim)),
        "blocks": [],
    }
    for _ in range(layers):
        p["blocks"].append({
            "ln1_g": jnp.ones((width,), jnp.float32),
            "ln1_b": jnp.zeros((width,), jnp.float32),
            "qkv_w": nrm(next(keys), (width, 3 * width)),
            "qkv_b": nrm(next(keys), (3 * width,)),
            "out_w": nrm(next(keys), (width, width)),
            "out_b": nrm(next(keys), (width,)),
            "ln2_g": jnp.ones((width,), jnp.float32),
            "ln2_b": jnp.zeros((width,), jnp.float32),
            "fc_w": nrm(next(keys), (width, 4 * width)),
            "fc_b": nrm(next(keys), (4 * width,)),
            "proj_w": nrm(next(keys), (4 * width, width)),
            "proj_b": nrm(next(keys), (width,)),
        })
    return p


def encode_image(image, params, *, patch, heads):
    """image: (B, C, H, W) float32 (NCHW, like PyTorch). Returns (B, embed_dim)."""
    B, C, H, W_img = image.shape
    gh, gw = H // patch, W_img // patch
    width = params["conv_w"].shape[1]

    # --- conv1 (stride=kernel=patch, bias=False) as patch-matmul (Pallas) ---
    x = image.reshape(B, C, gh, patch, gw, patch)
    x = x.transpose(0, 2, 4, 1, 3, 5)                        # (B, gh, gw, C, p, p)
    patches = x.reshape(B * gh * gw, C * patch * patch)
    x = matmul_bias(patches, params["conv_w"])               # (B*N, width), no bias
    x = x.reshape(B, gh * gw, width)

    # --- class token + positional embedding ---
    cls = jnp.broadcast_to(params["class_emb"][None, None, :], (B, 1, width))
    x = jnp.concatenate([cls, x], axis=1)                    # (B, S, width)
    x = x + params["pos_emb"][None, :, :]
    S = x.shape[1]

    # --- ln_pre ---
    x2d = layernorm(x.reshape(B * S, width), params["ln_pre_g"], params["ln_pre_b"])

    head_dim = width // heads
    scale = head_dim ** -0.5

    # --- transformer residual blocks (pre-LN) ---
    for blk in params["blocks"]:
        h = layernorm(x2d, blk["ln1_g"], blk["ln1_b"])
        qkv = matmul_bias(h, blk["qkv_w"], blk["qkv_b"],
                          out_dtype=jnp.bfloat16)            # (B*S, 3*width)
        a = attention(qkv.reshape(B, S, 3 * width),
                      heads=heads, scale=scale)              # (B, S, width) bf16
        # out-projection with the residual add fused into the epilogue
        x2d = matmul_bias(a.reshape(B * S, width), blk["out_w"], blk["out_b"],
                          residual=x2d)

        h = layernorm(x2d, blk["ln2_g"], blk["ln2_b"])
        h = matmul_bias(h, blk["fc_w"], blk["fc_b"], activation="quick_gelu",
                        out_dtype=jnp.bfloat16)
        # mlp projection with the residual add fused into the epilogue
        x2d = matmul_bias(h, blk["proj_w"], blk["proj_b"], residual=x2d)

    # --- ln_post on CLS token, then projection (no bias) ---
    x = x2d.reshape(B, S, width)
    cls_tok = layernorm(x[:, 0, :], params["ln_post_g"], params["ln_post_b"])
    return matmul_bias(cls_tok, params["proj"])


# --------------------------- pure-JAX reference ------------------------------

def _ln_ref(x, g, b, eps=1e-5):
    m = jnp.mean(x, -1, keepdims=True)
    v = jnp.mean((x - m) ** 2, -1, keepdims=True)
    return (x - m) * jax.lax.rsqrt(v + eps) * g + b


def encode_image_ref(image, params, *, patch, heads):
    B, C, H, W_img = image.shape
    gh, gw = H // patch, W_img // patch
    width = params["conv_w"].shape[1]
    x = image.reshape(B, C, gh, patch, gw, patch).transpose(0, 2, 4, 1, 3, 5)
    x = x.reshape(B * gh * gw, C * patch * patch) @ params["conv_w"]
    x = x.reshape(B, gh * gw, width)
    cls = jnp.broadcast_to(params["class_emb"][None, None, :], (B, 1, width))
    x = jnp.concatenate([cls, x], axis=1) + params["pos_emb"][None, :, :]
    S = x.shape[1]
    x = _ln_ref(x, params["ln_pre_g"], params["ln_pre_b"])
    hd = width // heads
    for blk in params["blocks"]:
        h = _ln_ref(x, blk["ln1_g"], blk["ln1_b"])
        qkv = h @ blk["qkv_w"] + blk["qkv_b"]
        qkv = qkv.reshape(B, S, 3, heads, hd)
        q, k, v = (qkv[:, :, i].transpose(0, 2, 1, 3) for i in range(3))
        s = jnp.einsum("bhqd,bhkd->bhqk", q * hd ** -0.5, k)
        p = jax.nn.softmax(s, axis=-1)
        a = jnp.einsum("bhqk,bhkd->bhqd", p, v).transpose(0, 2, 1, 3).reshape(B, S, width)
        x = x + (a @ blk["out_w"] + blk["out_b"])
        h = _ln_ref(x, blk["ln2_g"], blk["ln2_b"])
        h = h @ blk["fc_w"] + blk["fc_b"]
        h = h * jax.nn.sigmoid(1.702 * h)
        x = x + (h @ blk["proj_w"] + blk["proj_b"])
    cls_tok = _ln_ref(x[:, 0, :], params["ln_post_g"], params["ln_post_b"])
    return cls_tok @ params["proj"]


# ------------------------------------ main -----------------------------------

if __name__ == "__main__":
    # Small but structurally representative config.
    B, C, H, W = 2, 3, 32, 32
    patch, width, layers, heads, embed_dim = 8, 64, 2, 4, 32
    num_patches = (H // patch) * (W // patch)          # 16 -> S = 17

    key = jax.random.PRNGKey(0)
    k_params, k_img = jax.random.split(key)
    params = init_params(k_params, C, patch, width, layers, heads, embed_dim,
                         num_patches)
    image = jax.random.normal(k_img, (B, C, H, W), jnp.float32)

    out = encode_image(image, params, patch=patch, heads=heads)
    out = jax.block_until_ready(out)
    assert out.shape == (B, embed_dim), out.shape

    ref = encode_image_ref(image, params, patch=patch, heads=heads)
    # bf16 MXU operands + approx reciprocal in attention => slightly looser tol.
    max_diff = float(jnp.max(jnp.abs(out - ref)))
    assert jnp.allclose(out, ref, atol=2e-2, rtol=2e-2), max_diff

    # TODO(synk): real ImageCLIP wraps a pretrained CLIP checkpoint; weights here
    # are synthetic deterministic initializations (no .pt loading).
    print("KERNEL_OK")
</pallas_src>

<mosaic_0001>
module attributes {stable_mosaic.version = 11 : i64} {
  func.func @kernel(%arg0: i32, %arg1: i32, %arg2: i32, %arg3: memref<32x256xbf16, #tpu.memory_space<vmem>>, %arg4: memref<256x128xbf16, #tpu.memory_space<vmem>>, %arg5: memref<32x128xf32, #tpu.memory_space<vmem>>, %arg6: memref<32x128xf32, #tpu.memory_space<vmem>>) attributes {dimension_semantics = [#tpu.dimension_semantics<parallel>, #tpu.dimension_semantics<parallel>, #tpu.dimension_semantics<arbitrary>], iteration_bounds = array<i64: 1, 1, 1>, scalar_prefetch = 0 : i64, scratch_operands = 1 : i64, tpu.core_type = #tpu.core_type<tc>, window_params = [{transform_indices = @transform_0, window_bounds = array<i64: 32, 256>}, {transform_indices = @transform_1, window_bounds = array<i64: 256, 128>}, {transform_indices = @transform_2, window_bounds = array<i64: 32, 128>}]} {
    %c0_i32 = arith.constant 0 : i32
    %0 = arith.cmpi eq, %arg2, %c0_i32 : i32
    %1 = arith.extui %0 : i1 to i32
    %c0_i32_0 = arith.constant 0 : i32
    %2 = arith.cmpi ne, %1, %c0_i32_0 : i32
    scf.if %2 {
      %cst_10 = arith.constant 0.000000e+00 : f32
      %12 = vector.broadcast %cst_10 : f32 to vector<32x128xf32>
      %c0_11 = arith.constant 0 : index
      %c0_12 = arith.constant 0 : index
      %13 = vector.load %arg6[%c0_11, %c0_12] : memref<32x128xf32, #tpu.memory_space<vmem>>, vector<32x128xf32>
      tpu.vector_store %arg6[%c0_11, %c0_12], %12 {strides = array<i32>} : memref<32x128xf32, #tpu.memory_space<vmem>>, vector<32x128xf32>,
    } else {
    }
    %c0 = arith.constant 0 : index
    %c0_1 = arith.constant 0 : index
    %3 = vector.load %arg6[%c0, %c0_1] : memref<32x128xf32, #tpu.memory_space<vmem>>, vector<32x128xf32>
    %c0_2 = arith.constant 0 : index
    %c0_3 = arith.constant 0 : index
    %4 = vector.load %arg3[%c0_2, %c0_3] : memref<32x256xbf16, #tpu.memory_space<vmem>>, vector<32x256xbf16>
    %c0_4 = arith.constant 0 : index
    %c0_5 = arith.constant 0 : index
    %5 = vector.load %arg4[%c0_4, %c0_5] : memref<256x128xbf16, #tpu.memory_space<vmem>>, vector<256x128xbf16>
    %cst = arith.constant dense<0.000000e+00> : vector<32x128xf32>
    %6 = tpu.matmul %4, %5, %cst {dimension_numbers = #tpu.dot_dimension_numbers<[1], [0], [0], [1], [0, 0, 1, 1], [], []>} : vector<32x256xbf16>, vector<256x128xbf16>, vector<32x128xf32> -> vector<32x128xf32>
    %7 = arith.addf %3, %6 : vector<32x128xf32>
    %c0_6 = arith.constant 0 : index
    %c0_7 = arith.constant 0 : index
    %8 = vector.load %arg6[%c0_6, %c0_7] : memref<32x128xf32, #tpu.memory_space<vmem>>, vector<32x128xf32>
    tpu.vector_store %arg6[%c0_6, %c0_7], %7 {strides = array<i32>} : memref<32x128xf32, #tpu.memory_space<vmem>>, vector<32x128xf32>,
    %c0_i32_8 = arith.constant 0 : i32
    %9 = arith.cmpi eq, %arg2, %c0_i32_8 : i32
    %10 = arith.extui %9 : i1 to i32
    %c0_i32_9 = arith.constant 0 : i32
    %11 = arith.cmpi ne, %10, %c0_i32_9 : i32
    scf.if %11 {
      %c0_10 = arith.constant 0 : index
      %c0_11 = arith.constant 0 : index
      %12 = vector.load %arg6[%c0_10, %c0_11] : memref<32x128xf32, #tpu.memory_space<vmem>>, vector<32x128xf32>
      %c0_12 = arith.constant 0 : index
      %c0_13 = arith.constant 0 : index
      %13 = vector.load %arg5[%c0_12, %c0_13] : memref<32x128xf32, #tpu.memory_space<vmem>>, vector<32x128xf32>
      tpu.vector_store %arg5[%c0_12, %c0_13], %12 {strides = array<i32>} : memref<32x128xf32, #tpu.memory_space<vmem>>, vector<32x128xf32>,
    } else {
    }
    return
  }
  func.func @transform_0(%arg0: i32, %arg1: i32, %arg2: i32) -> (i32, i32) {
    %c0_i32 = arith.constant 0 : i32
    return %arg0, %arg2 : i32, i32
  }
  func.func @transform_1(%arg0: i32, %arg1: i32, %arg2: i32) -> (i32, i32) {
    %c0_i32 = arith.constant 0 : i32
    return %arg2, %arg1 : i32, i32
  }
  func.func @transform_2(%arg0: i32, %arg1: i32, %arg2: i32) -> (i32, i32) {
    %c0_i32 = arith.constant 0 : i32
    return %arg0, %arg1 : i32, i32
  }
}

</mosaic_0001>

<bundles_post_ra>
// kernel: tpu_custom_call.1
= control target key start
LH: loop header
LB: loop body
LE: loop exit
PB: predicated region body
PF: predicated region fallthrough
CT: control target
= control target key end

     0   :  { %7 = vsyncpa [#allocation4], 0  ;;  %s487_s0 = inlined_call_operand.hbm [shape: bf16[32,256], index: 0, kind: input, shape index: {}]   ;;  %s488_s1 = inlined_call_operand.hbm [shape: bf16[256,128], index: 1, kind: input, shape index: {}]   ;;  %s489_s2 = inlined_call_operand.hbm [shape: f32[32,128], index: 2, kind: output, shape index: {}]  }
   0x1   :  { %8 = vsyncpa [#allocation7], 0 }
   0x2   :  { %9 = vsyncpa [#allocation5], 0  ;;  %s450_s9 = smov [#allocation3]  }
   0x3   :  { %s15_s10 = sshll.u32 %s450_s9, 4  ;;  %s16_s10 = int_to_ptr.vmem [resolvable:$true] %s15_s10 }
   0x4   :  { %s392_s11 = scalar_lea.vmem %s16_s10, 512  ;;  %p397_p1 = scmp.lt.s32.totalorder %s16_s10, %s16_s10 }
   0x5   :  { %p393_p0 = scmp.ne.s32.totalorder %s16_s10, %s392_s11  ;;  %p398_p2 = scmp.lt.s32.totalorder %s392_s11, %s392_s11 }
   0x7   :  { %p399_p3 = por %p398_p2, %p397_p1 }
   0x9   :  { %p400_p4 = pnand %p399_p3, %p393_p0 }
   0xb   :  { %403 = shalt.err (!%p400_p4)
}
   0xc   :  { %s451_s12 = smov 128   ;;  %s452_s13 = smov 8  }
   0xd   :  { %21 = dma.hbm_to_vmem [thread:$0]  %s487_s0, 512, %s16_s10, [#allocation4], %s451_s12, %s451_s12, %s452_s13  }
   0xe   :  { %s453_s16 = smov [#allocation6]  }
   0xf   :  { %s27_s17 = sshll.u32 %s453_s16, 4  ;;  %s28_s17 = int_to_ptr.vmem [resolvable:$true] %s27_s17 }
  0x10   :  { %s412_s18 = scalar_lea.vmem %s28_s17, 2048  ;;  %p417_p6 = scmp.lt.s32.totalorder %s28_s17, %s28_s17 }
  0x11   :  { %p413_p5 = scmp.ne.s32.totalorder %s28_s17, %s412_s18  ;;  %p418_p7 = scmp.lt.s32.totalorder %s412_s18, %s412_s18 }
  0x13   :  { %p419_p8 = por %p418_p7, %p417_p6 }
  0x15   :  { %p420_p9 = pnand %p419_p8, %p413_p5 }
  0x17   :  { %423 = shalt.err (!%p420_p9)
}
  0x18   :  { %s454_s19 = smov 64   ;;  %s455_s20 = smov 4  }
  0x19   :  { %33 = dma.hbm_to_vmem [thread:$0]  %s488_s1, 2048, %s28_s17, [#allocation7], %s454_s19, %s454_s19, %s455_s20  }
  0x1a   :  { %444 = dma.done.wait [#allocation4], 512  }
  0x1b   :  { %445 = vsyncadd [#allocation4], 4294966784 }
  0x1c   :  { %446 = dma.done.wait [#allocation7], 2048  }
  0x1d   :  { %447 = vsyncadd [#allocation7], 4294965248  ;;  %v362_v0 = vld [vmem:[#allocation6 + $0x78] sm:$0xff]   ;;  %v364_v2 = vld [vmem:[#allocation6 + $0x70] sm:$0xff]   ;;  %s456_s0 = smov [#allocation8]  }
  0x1e   :  { %v363_v1 = vld [vmem:[#allocation6 + $0x38] sm:$0xff]   ;;  %311 = vmatprep.subr.bf16.mxu0 %v362_v0  ;;  %339 = vmatprep.subr.bf16.mxu1 %v362_v0  ;;  %v365_v3 = vld [vmem:[#allocation6 + $0x30] sm:$0xff]   ;;  %v366_v4 = vld [vmem:[#allocation6 + $0x68] sm:$0xff]   ;;  %s278_s1 = sshll.u32 %s456_s0, 4  ;;  %s279_s1 = int_to_ptr.vmem [resolvable:$true] %s278_s1 }
  0x1f   :  { %312 = vmatpush3.bf16.msra.mxu0 %v363_v1  ;;  %347 = vmatpush3.bf16.msra.mxu1 %v363_v1  ;;  %v367_v5 = vld [vmem:[#allocation6 + $0x28] sm:$0xff]   ;;  %v368_v6 = vld [vmem:[#allocation6 + $0x60] sm:$0xff]   ;;  %v370_v8 = vld [vmem:[#allocation6 + $0x58] sm:$0xff]   ;;  %s424_s23 = scalar_lea.vmem %s279_s1, 512  ;;  %p429_p11 = scmp.lt.s32.totalorder %s279_s1, %s279_s1 }
  0x20   :  { %313 = vmatprep.subr.bf16.mxu0 %v364_v2  ;;  %340 = vmatprep.subr.bf16.mxu1 %v364_v2  ;;  %v369_v7 = vld [vmem:[#allocation6 + $0x20] sm:$0xff]   ;;  %v371_v9 = vld [vmem:[#allocation6 + $0x18] sm:$0xff]   ;;  %v372_v10 = vld [vmem:[#allocation6 + $0x50] sm:$0xff]   ;;  %p425_p10 = scmp.ne.s32.totalorder %s279_s1, %s424_s23  ;;  %p430_p12 = scmp.lt.s32.totalorder %s424_s23, %s424_s23 }
  0x21   :  { %v380_v11 = vld [vmem:[#allocation3 + $0x4] ss:$8 sps:$4 sm:$0xff]   ;;  %v383_v12 = vld [vmem:[#allocation3 + $0x14] ss:$8 sps:$4 sm:$0xff]   ;;  %v378_v18 = vld [vmem:[#allocation3] ss:$8 sps:$4 sm:$0xff]  }
  0x22   :  { %v373_v13 = vld [vmem:[#allocation6 + $0x10] sm:$0xff]   ;;  %v374_v14 = vld [vmem:[#allocation6 + $0x48] sm:$0xff]   ;;  %237 = vmatprep.mubr.bf16.mxu0 %v380_v11  ;;  %245 = vmatprep.mubr.bf16.mxu1 %v383_v12  ;;  %v376_v16 = vld [vmem:[#allocation6 + $0x40] sm:$0xff]   ;;  %p431_p13 = por %p430_p12, %p429_p11 }
  0x23   :  { %314 = vmatpush3.bf16.msra.mxu0 %v365_v3  ;;  %348 = vmatpush3.bf16.msra.mxu1 %v365_v3  ;;  %v375_v15 = vld [vmem:[#allocation6 + $0x8] sm:$0xff]   ;;  %v377_v17 = vld [vmem:[#allocation6] sm:$0xff]   ;;  %v381_v19 = vld [vmem:[#allocation3 + $0x10] ss:$8 sps:$4 sm:$0xff]  }
  0x24   :  { %315 = vmatprep.subr.bf16.mxu0 %v366_v4  ;;  %341 = vmatprep.subr.bf16.mxu1 %v366_v4  ;;  %p432_p0 = pnand %p431_p13, %p425_p10 }
  0x27   :  { %316 = vmatpush3.bf16.msra.mxu0 %v367_v5  ;;  %349 = vmatpush3.bf16.msra.mxu1 %v367_v5 }
  0x28   :  { %317 = vmatprep.subr.bf16.mxu0 %v368_v6  ;;  %342 = vmatprep.subr.bf16.mxu1 %v368_v6 }
  0x2b   :  { %318 = vmatpush3.bf16.msra.mxu0 %v369_v7  ;;  %350 = vmatpush3.bf16.msra.mxu1 %v369_v7 }
  0x2c   :  { %319 = vmatprep.subr.bf16.mxu0 %v370_v8  ;;  %343 = vmatprep.subr.bf16.mxu1 %v370_v8 }
  0x2f   :  { %320 = vmatpush3.bf16.msra.mxu0 %v371_v9  ;;  %351 = vmatpush3.bf16.msra.mxu1 %v371_v9 }
  0x30   :  { %321 = vmatprep.subr.bf16.mxu0 %v372_v10  ;;  %344 = vmatprep.subr.bf16.mxu1 %v372_v10 }
  0x33   :  { %322 = vmatpush3.bf16.msra.mxu0 %v373_v13  ;;  %352 = vmatpush3.bf16.msra.mxu1 %v373_v13 }
  0x34   :  { %323 = vmatprep.subr.bf16.mxu0 %v374_v14  ;;  %345 = vmatprep.subr.bf16.mxu1 %v374_v14 }
  0x37   :  { %324 = vmatpush3.bf16.msra.mxu0 %v375_v15  ;;  %353 = vmatpush3.bf16.msra.mxu1 %v375_v15 }
  0x38   :  { %325 = vmatprep.subr.bf16.mxu0 %v376_v16  ;;  %346 = vmatprep.subr.bf16.mxu1 %v376_v16 }
  0x3b   :  { %326 = vmatpush3.bf16.msra.mxu0 %v377_v17  ;;  %354 = vmatpush3.bf16.msra.mxu1 %v377_v17 }
  0x3e   :  { %238 = vmatmul.mubr.bf16.vlgmr.msra.gmra.mxu0 %v378_v18  ;;  %246 = vmatmul.mubr.bf16.vlgmr.msra.gmra.mxu1 %v381_v19 }
  0xfe   :  { %v327_v20 = vpop.f32.mrf.mxu0  ;;  %v333_v21 = vpop.f32.mrf.mxu1 }
 0x100   :  { %v328_v22 = vpop.f32.mrf.mxu0  ;;  %v334_v23 = vpop.f32.mrf.mxu1 }
 0x101   :  { %v329_v24 = vadd.f32 %v328_v22, %v327_v20  ;;  %v335_v25 = vadd.f32 %v334_v23, %v333_v21 }
 0x102   :  { %v330_v26 = vpop.f32.mrf.mxu0  ;;  %v336_v27 = vpop.f32.mrf.mxu1 }
 0x103   :  { %269 = vst [vmem:[#allocation8] sm:$0xff] %v329_v24  ;;  %271 = vst [vmem:[#allocation8 + $0x10] sm:$0xff] %v335_v25 }
 0x104   :  { %v331_v28 = vpop.f32.mrf.mxu0  ;;  %v337_v29 = vpop.f32.mrf.mxu1 }
 0x105   :  { %v332_v30 = vadd.f32 %v331_v28, %v330_v26  ;;  %v338_v31 = vadd.f32 %v337_v29, %v336_v27 }
 0x107   :  { %270 = vst [vmem:[#allocation8 + $0x8] sm:$0xff] %v332_v30  ;;  %272 = vst [vmem:[#allocation8 + $0x18] sm:$0xff] %v338_v31 }
 0x108   :  { %435 = shalt.err (!%p432_p0)
}
 0x109   :  { %284 = dma.vmem_to_hbm [thread:$0]  %s279_s1, 512, %s489_s2, [#allocation5], %s451_s12, %s451_s12, %s452_s13  }
 0x10a   :  { %448 = dma.done.wait [#allocation5], 512  }
 0x10b   :  { %449 = vsyncadd [#allocation5], 4294966784 }
 0x10c   :  { %288 = vsyncpa [#allocation4], 1 }
 0x10d   :  { %289 = vsyncpa [#allocation7], 1 }
 0x10e   :  { %290 = vsyncpa [#allocation5], 1 }

</bundles_post_ra>
